<compile_context>
chip_gen: v7x
topology: tpu7x:2x2x1
jax: 0.10.0
libtpu: 0.0.40
codegen_flags: <defaults>
</compile_context>

<pallas_src>
import functools

import jax
import jax.numpy as jnp
from jax.experimental import pallas as pl
from jax.experimental.pallas import tpu as pltpu

_LANES = 128
_ROW_TILE = 2048  # sublanes per grid step: 1 MiB f32 + 1 MiB int32 per block


def _dice_sums_kernel(x_ref, t_ref, out_ref, acc_ref, *,
                      rows, row_tile, blocks_per_core, need_mask):
    """Accumulate per-lane/per-sublane partial sums of S, T, I.

    x_ref:   (row_tile, 128) logits block (original dtype, cast in-kernel).
    t_ref:   (row_tile, 128) raw target block (int; `== 1` done here).
    out_ref: (3, 8, 128) f32 partial-sum slab for this parallel slice.
    acc_ref: (3, 8, 128) f32 VMEM accumulator, resident across the k axis.
    """
    p_idx = pl.program_id(0)
    k_idx = pl.program_id(1)
    n_k = pl.num_programs(1)

    @pl.when(k_idx == 0)
    def _():
        acc_ref[...] = jnp.zeros_like(acc_ref)

    x = x_ref[...].astype(jnp.float32)
    t_pos = (t_ref[...] == 1)

    prob = jax.nn.sigmoid(x)  # EUP

    if need_mask:
        # Logical (unclamped) global block index; rows past `rows` hold stale
        # VMEM data for partial / clamped blocks, so mask BOTH terms.
        g = p_idx * blocks_per_core + k_idx
        valid = rows - g * row_tile
        row_ids = jax.lax.broadcasted_iota(jnp.int32, (row_tile, _LANES), 0)
        mask = row_ids < valid
        prob = jnp.where(mask, prob, 0.0)
        t_pos = jnp.logical_and(mask, t_pos)

    tgt = t_pos.astype(jnp.float32)

    def accumulate(idx, v):
        if row_tile % 8 == 0:
            # Pure VALU vreg-tree adds; defer the XLU reduce to the wrapper.
            part = jnp.sum(v.reshape(row_tile // 8, 8, _LANES), axis=0)
            acc_ref[idx] += part
        else:
            # Tiny single-block (full-extent) case only; perf irrelevant.
            acc_ref[idx, 0:1, :] += jnp.sum(v, axis=0, keepdims=True)

    accumulate(0, prob)         # S partials
    accumulate(1, tgt)          # T partials
    accumulate(2, prob * tgt)   # I partials

    @pl.when(k_idx == n_k - 1)
    def _():
        out_ref[...] = acc_ref[...]


def dice_loss(logits, target, smooth=1e-07):
    """Pallas implementation of DiceLoss.forward for num_classes == 1."""
    B, C, H, W = logits.shape
    assert C == 1, "only the binary (num_classes == 1) path is implemented"

    total = B * H * W
    x_flat = logits.reshape(total)   # keep original dtype (f32 or bf16)
    t_flat = target.reshape(total)   # keep original int dtype

    rows = total // _LANES
    rem = total - rows * _LANES

    S = jnp.float32(0.0)
    T = jnp.float32(0.0)
    I = jnp.float32(0.0)

    if rows > 0:
        main = rows * _LANES
        # When rem == 0 these reshapes are free (no copy). When rem > 0 XLA may
        # materialize the prefix slice once; the tail (< 128 elems) is handled
        # below in plain JAX.
        x2 = x_flat[:main].reshape(rows, _LANES)
        t2 = t_flat[:main].reshape(rows, _LANES)

        if rows <= _ROW_TILE:
            row_tile = rows          # single full-extent block
            n_tiles = 1
        else:
            row_tile = _ROW_TILE     # multiple of 32: safe for all dtypes
            n_tiles = pl.cdiv(rows, row_tile)

        P = 2 if n_tiles >= 2 else 1          # shard across both TCs on v7x
        K = pl.cdiv(n_tiles, P)
        last_block = n_tiles - 1
        need_mask = (P * K != n_tiles) or (rows % row_tile != 0)

        def in_map(p, k):
            # Clamp so over-covering blocks re-read the last valid block
            # (their contribution is masked to zero in-kernel).
            g = jnp.minimum(p * K + k, last_block)
            return (g, 0)

        kernel = functools.partial(
            _dice_sums_kernel, rows=rows, row_tile=row_tile,
            blocks_per_core=K, need_mask=need_mask)

        bytes_accessed = int(
            x2.size * x2.dtype.itemsize
            + t2.size * t2.dtype.itemsize
            + P * 3 * 8 * _LANES * 4)

        sums = pl.pallas_call(
            kernel,
            out_shape=jax.ShapeDtypeStruct((P, 3, 8, _LANES), jnp.float32),
            grid_spec=pltpu.PrefetchScalarGridSpec(
                num_scalar_prefetch=0,
                grid=(P, K),
                in_specs=[
                    pl.BlockSpec((row_tile, _LANES), in_map),
                    pl.BlockSpec((row_tile, _LANES), in_map),
                ],
                out_specs=pl.BlockSpec((None, 3, 8, _LANES),
                                       lambda p, k: (p, 0, 0, 0)),
                scratch_shapes=[pltpu.VMEM((3, 8, _LANES), jnp.float32)],
            ),
            compiler_params=pltpu.CompilerParams(
                dimension_semantics=("parallel", "arbitrary")),
            cost_estimate=pl.CostEstimate(
                flops=8 * main,
                transcendentals=main,
                bytes_accessed=bytes_accessed),
        )(x2, t2)

        lane_sums = jnp.sum(sums, axis=(0, 2, 3))   # (3,)
        S = lane_sums[0]
        T = lane_sums[1]
        I = lane_sums[2]

    if rem > 0:
        # < 128-element lane remainder: tiny plain-JAX correction.
        x_tail = x_flat[rows * _LANES:].astype(jnp.float32)
        t_tail = (t_flat[rows * _LANES:] == 1).astype(jnp.float32)
        p_tail = jax.nn.sigmoid(x_tail)
        S = S + jnp.sum(p_tail)
        T = T + jnp.sum(t_tail)
        I = I + jnp.sum(p_tail * t_tail)

    n = jnp.float32(total)
    # pos class: inter = I, card = S + T
    # neg class: inter = N - S - T + I, card = 2N - S - T   (targets in {0,1})
    intersection = jnp.stack([I, n - S - T + I])
    cardinality = jnp.stack([S + T, 2.0 * n - S - T])
    dice = jnp.mean(2.0 * intersection / (cardinality + smooth))
    return 1.0 - dice


def _dice_loss_ref(logits, target, smooth=1e-07):
    """Pure-JAX reference matching the PyTorch num_classes == 1 semantics."""
    pos = jax.nn.sigmoid(logits.astype(jnp.float32))    # (B, 1, H, W)
    neg = 1.0 - pos
    probas = jnp.concatenate([pos, neg], axis=1)        # (B, 2, H, W)
    t_oh = jnp.stack([(target == 1), (target == 0)], axis=1).astype(jnp.float32)
    inter = jnp.sum(probas * t_oh, axis=(0, 2, 3))
    card = jnp.sum(probas + t_oh, axis=(0, 2, 3))
    return 1.0 - jnp.mean(2.0 * inter / (card + smooth))


if __name__ == "__main__":
    key = jax.random.PRNGKey(0)

    cases = [
        ((2, 1, 16, 16), jnp.float32),    # primary small shape (single block)
        ((2, 1, 256, 256), jnp.float32),  # one big full-extent block
        ((1, 1, 5, 7), jnp.float32),      # < 128 elems: lane-remainder path
        ((3, 1, 300, 300), jnp.float32),  # multi-tile, masked partial block + tail
        ((2, 1, 64, 64), jnp.bfloat16),   # bf16 logits streamed without upcast
    ]
    for (B, C, H, W), dt in cases:
        key, k1, k2 = jax.random.split(key, 3)
        logits = jax.random.normal(k1, (B, C, H, W), dtype=jnp.float32).astype(dt)
        target = jax.random.randint(k2, (B, H, W), 0, 2, dtype=jnp.int32)

        loss = jax.block_until_ready(dice_loss(logits, target))
        ref = jax.block_until_ready(_dice_loss_ref(logits, target))

        tol = 1e-5 if dt == jnp.float32 else 1e-4
        assert jnp.isfinite(loss), (B, H, W, dt, loss)
        assert jnp.allclose(loss, ref, rtol=tol, atol=tol), (B, H, W, dt, loss, ref)

    print("KERNEL_OK")
</pallas_src>

<mosaic_0001>
module attributes {stable_mosaic.version = 11 : i64} {
  func.func @_dice_sums_kernel(%arg0: i32, %arg1: i32, %arg2: memref<4x128xf32, #tpu.memory_space<vmem>>, %arg3: memref<4x128xi32, #tpu.memory_space<vmem>>, %arg4: memref<1x3x8x128xf32, #tpu.memory_space<vmem>>, %arg5: memref<3x8x128xf32, #tpu.memory_space<vmem>>) attributes {dimension_semantics = [#tpu.dimension_semantics<parallel>, #tpu.dimension_semantics<arbitrary>], iteration_bounds = array<i64: 1, 1>, scalar_prefetch = 0 : i64, scratch_operands = 1 : i64, tpu.core_type = #tpu.core_type<tc>, window_params = [{transform_indices = @transform_0, window_bounds = array<i64: 4, 128>}, {transform_indices = @transform_1, window_bounds = array<i64: 4, 128>}, {transform_indices = @transform_2, window_bounds = array<i64: 1, 3, 8, 128>}]} {
    %c0_i32 = arith.constant 0 : i32
    %0 = arith.cmpi eq, %arg1, %c0_i32 : i32
    %1 = arith.extui %0 : i1 to i32
    %c0_i32_0 = arith.constant 0 : i32
    %2 = arith.cmpi ne, %1, %c0_i32_0 : i32
    scf.if %2 {
      %cst_25 = arith.constant 0.000000e+00 : f32
      %42 = vector.broadcast %cst_25 : f32 to vector<3x8x128xf32>
      %c0_26 = arith.constant 0 : index
      %c0_27 = arith.constant 0 : index
      %c0_28 = arith.constant 0 : index
      %43 = vector.load %arg5[%c0_26, %c0_27, %c0_28] : memref<3x8x128xf32, #tpu.memory_space<vmem>>, vector<3x8x128xf32>
      tpu.vector_store %arg5[%c0_26, %c0_27, %c0_28], %42 {strides = array<i32>} : memref<3x8x128xf32, #tpu.memory_space<vmem>>, vector<3x8x128xf32>,
    } else {
    }
    %c0 = arith.constant 0 : index
    %c0_1 = arith.constant 0 : index
    %3 = vector.load %arg2[%c0, %c0_1] : memref<4x128xf32, #tpu.memory_space<vmem>>, vector<4x128xf32>
    %c0_2 = arith.constant 0 : index
    %c0_3 = arith.constant 0 : index
    %4 = vector.load %arg3[%c0_2, %c0_3] : memref<4x128xi32, #tpu.memory_space<vmem>>, vector<4x128xi32>
    %c1_i32 = arith.constant 1 : i32
    %5 = vector.broadcast %c1_i32 : i32 to vector<4x128xi32>
    %6 = arith.cmpi eq, %4, %5 : vector<4x128xi32>
    %7 = arith.negf %3 : vector<4x128xf32>
    %8 = math.exp %7 : vector<4x128xf32>
    %cst = arith.constant 1.000000e+00 : f32
    %9 = vector.broadcast %cst : f32 to vector<4x128xf32>
    %10 = arith.addf %9, %8 : vector<4x128xf32>
    %11 = arith.divf %9, %10 : vector<4x128xf32>
    %12 = arith.extui %6 : vector<4x128xi1> to vector<4x128xi32>
    %13 = arith.sitofp %12 : vector<4x128xi32> to vector<4x128xf32>
    %c0_4 = arith.constant 0 : index
    %c0_5 = arith.constant 0 : index
    %c0_6 = arith.constant 0 : index
    %14 = vector.load %arg5[%c0_4, %c0_5, %c0_6] : memref<3x8x128xf32, #tpu.memory_space<vmem>>, vector<1x1x128xf32>
    %15 = vector.shape_cast %14 : vector<1x1x128xf32> to vector<1x128xf32>
    %cst_7 = arith.constant dense<0.000000e+00> : vector<128xf32>
    %16 = vector.multi_reduction <add>, %11, %cst_7 [0] : vector<4x128xf32> to vector<128xf32>
    %17 = vector.shape_cast %16 : vector<128xf32> to vector<1x128xf32>
    %18 = arith.addf %15, %17 : vector<1x128xf32>
    %c0_8 = arith.constant 0 : index
    %c0_9 = arith.constant 0 : index
    %c0_10 = arith.constant 0 : index
    %19 = vector.load %arg5[%c0_8, %c0_9, %c0_10] : memref<3x8x128xf32, #tpu.memory_space<vmem>>, vector<1x1x128xf32>
    %20 = vector.shape_cast %19 : vector<1x1x128xf32> to vector<1x128xf32>
    %21 = vector.shape_cast %18 : vector<1x128xf32> to vector<1x1x128xf32>
    tpu.vector_store %arg5[%c0_8, %c0_9, %c0_10], %21 {strides = array<i32>} : memref<3x8x128xf32, #tpu.memory_space<vmem>>, vector<1x1x128xf32>,
    %c1 = arith.constant 1 : index
    %c0_11 = arith.constant 0 : index
    %c0_12 = arith.constant 0 : index
    %22 = vector.load %arg5[%c1, %c0_11, %c0_12] : memref<3x8x128xf32, #tpu.memory_space<vmem>>, vector<1x1x128xf32>
    %23 = vector.shape_cast %22 : vector<1x1x128xf32> to vector<1x128xf32>
    %cst_13 = arith.constant dense<0.000000e+00> : vector<128xf32>
    %24 = vector.multi_reduction <add>, %13, %cst_13 [0] : vector<4x128xf32> to vector<128xf32>
    %25 = vector.shape_cast %24 : vector<128xf32> to vector<1x128xf32>
    %26 = arith.addf %23, %25 : vector<1x128xf32>
    %c1_14 = arith.constant 1 : index
    %c0_15 = arith.constant 0 : index
    %c0_16 = arith.constant 0 : index
    %27 = vector.load %arg5[%c1_14, %c0_15, %c0_16] : memref<3x8x128xf32, #tpu.memory_space<vmem>>, vector<1x1x128xf32>
    %28 = vector.shape_cast %27 : vector<1x1x128xf32> to vector<1x128xf32>
    %29 = vector.shape_cast %26 : vector<1x128xf32> to vector<1x1x128xf32>
    tpu.vector_store %arg5[%c1_14, %c0_15, %c0_16], %29 {strides = array<i32>} : memref<3x8x128xf32, #tpu.memory_space<vmem>>, vector<1x1x128xf32>,
    %30 = arith.mulf %11, %13 : vector<4x128xf32>
    %c2 = arith.constant 2 : index
    %c0_17 = arith.constant 0 : index
    %c0_18 = arith.constant 0 : index
    %31 = vector.load %arg5[%c2, %c0_17, %c0_18] : memref<3x8x128xf32, #tpu.memory_space<vmem>>, vector<1x1x128xf32>
    %32 = vector.shape_cast %31 : vector<1x1x128xf32> to vector<1x128xf32>
    %cst_19 = arith.constant dense<0.000000e+00> : vector<128xf32>
    %33 = vector.multi_reduction <add>, %30, %cst_19 [0] : vector<4x128xf32> to vector<128xf32>
    %34 = vector.shape_cast %33 : vector<128xf32> to vector<1x128xf32>
    %35 = arith.addf %32, %34 : vector<1x128xf32>
    %c2_20 = arith.constant 2 : index
    %c0_21 = arith.constant 0 : index
    %c0_22 = arith.constant 0 : index
    %36 = vector.load %arg5[%c2_20, %c0_21, %c0_22] : memref<3x8x128xf32, #tpu.memory_space<vmem>>, vector<1x1x128xf32>
    %37 = vector.shape_cast %36 : vector<1x1x128xf32> to vector<1x128xf32>
    %38 = vector.shape_cast %35 : vector<1x128xf32> to vector<1x1x128xf32>
    tpu.vector_store %arg5[%c2_20, %c0_21, %c0_22], %38 {strides = array<i32>} : memref<3x8x128xf32, #tpu.memory_space<vmem>>, vector<1x1x128xf32>,
    %c0_i32_23 = arith.constant 0 : i32
    %39 = arith.cmpi eq, %arg1, %c0_i32_23 : i32
    %40 = arith.extui %39 : i1 to i32
    %c0_i32_24 = arith.constant 0 : i32
    %41 = arith.cmpi ne, %40, %c0_i32_24 : i32
    scf.if %41 {
      %c0_25 = arith.constant 0 : index
      %c0_26 = arith.constant 0 : index
      %c0_27 = arith.constant 0 : index
      %42 = vector.load %arg5[%c0_25, %c0_26, %c0_27] : memref<3x8x128xf32, #tpu.memory_space<vmem>>, vector<3x8x128xf32>
      %c0_28 = arith.constant 0 : index
      %c0_29 = arith.constant 0 : index
      %c0_30 = arith.constant 0 : index
      %c0_31 = arith.constant 0 : index
      %43 = vector.load %arg4[%c0_28, %c0_29, %c0_30, %c0_31] : memref<1x3x8x128xf32, #tpu.memory_space<vmem>>, vector<1x3x8x128xf32>
      %44 = vector.shape_cast %43 : vector<1x3x8x128xf32> to vector<3x8x128xf32>
      %45 = vector.shape_cast %42 : vector<3x8x128xf32> to vector<1x3x8x128xf32>
      tpu.vector_store %arg4[%c0_28, %c0_29, %c0_30, %c0_31], %45 {strides = array<i32>} : memref<1x3x8x128xf32, #tpu.memory_space<vmem>>, vector<1x3x8x128xf32>,
    } else {
    }
    return
  }
  func.func @transform_0(%arg0: i32, %arg1: i32) -> (i32, i32) {
    %c1_i32 = arith.constant 1 : i32
    %0 = arith.muli %arg0, %c1_i32 : i32
    %1 = arith.addi %0, %arg1 : i32
    %c0_i32 = arith.constant 0 : i32
    %2 = arith.minsi %1, %c0_i32 : i32
    %c0_i32_0 = arith.constant 0 : i32
    %c0_i32_1 = arith.constant 0 : i32
    return %2, %c0_i32_0 : i32, i32
  }
  func.func @transform_1(%arg0: i32, %arg1: i32) -> (i32, i32) {
    %c1_i32 = arith.constant 1 : i32
    %0 = arith.muli %arg0, %c1_i32 : i32
    %1 = arith.addi %0, %arg1 : i32
    %c0_i32 = arith.constant 0 : i32
    %2 = arith.minsi %1, %c0_i32 : i32
    %c0_i32_0 = arith.constant 0 : i32
    %c0_i32_1 = arith.constant 0 : i32
    return %2, %c0_i32_0 : i32, i32
  }
  func.func @transform_2(%arg0: i32, %arg1: i32) -> (i32, i32, i32, i32) {
    %c0_i32 = arith.constant 0 : i32
    %c0_i32_0 = arith.constant 0 : i32
    %c0_i32_1 = arith.constant 0 : i32
    %c0_i32_2 = arith.constant 0 : i32
    return %arg0, %c0_i32, %c0_i32_0, %c0_i32_1 : i32, i32, i32, i32
  }
}

</mosaic_0001>

<bundles_post_ra>
// kernel: tpu_custom_call.1
= control target key start
LH: loop header
LB: loop body
LE: loop exit
PB: predicated region body
PF: predicated region fallthrough
CT: control target
= control target key end

     0   :  { %7 = vsyncpa [#allocation4], 0  ;;  %s279_s0 = inlined_call_operand.hbm [shape: f32[4,128], index: 0, kind: input, shape index: {}]   ;;  %s280_s1 = inlined_call_operand.hbm [shape: s32[4,128], index: 1, kind: input, shape index: {}]   ;;  %s281_s2 = inlined_call_operand.hbm [shape: f32[1,3,8,128], index: 2, kind: output, shape index: {}]  }
   0x1   :  { %8 = vsyncpa [#allocation7], 0 }
   0x2   :  { %9 = vsyncpa [#allocation5], 0  ;;  %s219_s9 = smov [#allocation3]   ;;  %s220_s11 = smov [#allocation6]  }
   0x3   :  { %s21_s10 = sshll.u32 %s219_s9, 4  ;;  %s36_s12 = sshll.u32 %s220_s11, 4  ;;  %s22_s10 = int_to_ptr.vmem [resolvable:$true] %s21_s10  ;;  %s37_s12 = int_to_ptr.vmem [resolvable:$true] %s36_s12 }
   0x4   :  { %s147_s15 = scalar_lea.hbm %s279_s0, 64 }
   0x5   :  { %p148_p0 = scmp.ne.s32.totalorder %s279_s0, %s147_s15  ;;  %p151_p1 = scmp.lt.u32.totalorder %s147_s15, %s279_s0 }
   0x7   :  { %p153_p2 = pnand %p151_p1, %p148_p0 }
   0x9   :  { %156 = shalt.err (!%p153_p2)
}
   0xa   :  { %s157_s20 = scalar_lea.vmem %s22_s10, 64  ;;  %p162_p4 = scmp.lt.s32.totalorder %s22_s10, %s22_s10 }
   0xb   :  { %p158_p3 = scmp.ne.s32.totalorder %s22_s10, %s157_s20  ;;  %p163_p5 = scmp.lt.s32.totalorder %s157_s20, %s157_s20 }
   0xd   :  { %p164_p6 = por %p163_p5, %p162_p4 }
   0xf   :  { %p165_p7 = pnand %p164_p6, %p158_p3 }
  0x11   :  { %168 = shalt.err (!%p165_p7)
}
  0x12   :  { %24 = dma.hbm_to_vmem [thread:$0]  %s279_s0, 64, %s22_s10, [#allocation4]  }
  0x13   :  { %s169_s25 = scalar_lea.hbm %s280_s1, 64 }
  0x14   :  { %p170_p8 = scmp.ne.s32.totalorder %s280_s1, %s169_s25  ;;  %p173_p9 = scmp.lt.u32.totalorder %s169_s25, %s280_s1 }
  0x16   :  { %p175_p10 = pnand %p173_p9, %p170_p8 }
  0x18   :  { %178 = shalt.err (!%p175_p10)
}
  0x19   :  { %s179_s30 = scalar_lea.vmem %s37_s12, 64  ;;  %p184_p12 = scmp.lt.s32.totalorder %s37_s12, %s37_s12 }
  0x1a   :  { %p180_p11 = scmp.ne.s32.totalorder %s37_s12, %s179_s30  ;;  %p185_p13 = scmp.lt.s32.totalorder %s179_s30, %s179_s30 }
  0x1c   :  { %p186_p0 = por %p185_p13, %p184_p12 }
  0x1e   :  { %p187_p1 = pnand %p186_p0, %p180_p11 }
  0x20   :  { %190 = shalt.err (!%p187_p1)
}
  0x21   :  { %39 = dma.hbm_to_vmem [thread:$0]  %s280_s1, 64, %s37_s12, [#allocation7]  }
  0x22   :  { %213 = dma.done.wait [#allocation4], 64  }
  0x23   :  { %214 = vsyncadd [#allocation4], 4294967232 }
  0x24   :  { %215 = dma.done.wait [#allocation7], 64  }
  0x25   :  { %216 = vsyncadd [#allocation7], 4294967232  ;;  %v221_v0 = vmov 0.0   ;;  %v59_v1 = vld [vmem:[#allocation3] sm:$0xf]  ;;  %vm71_vm0 = vcmask 1043456  }
  0x26   :  { %57 = vst [vmem:[#allocation2 + $0x8] sm:$0xff] %v221_v0  ;;  %56 = vst [vmem:[#allocation2] sm:$0xff] %v221_v0  ;;  %v60_v2 = vld [vmem:[#allocation6] sm:$0xf]  ;;  %v135_v3 = vmul.f32 -1.442695, %v59_v1 }
  0x27   :  { %58 = vst [vmem:[#allocation2 + $0x10] sm:$0xff] %v221_v0  ;;  %vm61_vm1 = vcmp.eq.s32.totalorder %v60_v2, 1  ;;  %s222_s1 = smov [#allocation8]  }
  0x28   :  { %v136_v4 = vsel %vm61_vm1, 1.0, %v221_v0  ;;  %143 = vpow2.f32 %v135_v3  ;;  %s118_s4 = sshll.u32 %s222_s1, 4  ;;  %s119_s4 = int_to_ptr.vmem [resolvable:$true] %s118_s4 }
  0x29   :  { %v83_v5 = vsel %vm71_vm0, %v136_v4, 0.0  ;;  %s191_s5 = scalar_lea.vmem %s119_s4, 384  ;;  %p196_p3 = scmp.lt.s32.totalorder %s119_s4, %s119_s4 }
  0x2a   :  { %v84_v6 = vrot.slane %v83_v5, 4  ;;  %p192_p2 = scmp.ne.s32.totalorder %s119_s4, %s191_s5  ;;  %p197_p4 = scmp.lt.s32.totalorder %s191_s5, %s191_s5 }
  0x2c   :  { %v85_v7 = vadd.f32 %v84_v6, %v83_v5  ;;  %p198_p5 = por %p197_p4, %p196_p3 }
  0x2d   :  { %v82_v12 = vld [vmem:[#allocation2 + $0x8] sm:$0x1]  ;;  %v70_v30 = vld [vmem:[#allocation2] sm:$0x1] }
  0x2e   :  { %v86_v8 = vrot.slane %v85_v7, 2  ;;  %v94_v33 = vld [vmem:[#allocation2 + $0x10] sm:$0x1]  ;;  %p199_p6 = pnand %p198_p5, %p192_p2 }
  0x30   :  { %v87_v9 = vadd.f32 %v86_v8, %v85_v7 }
  0x32   :  { %v88_v10 = vrot.slane %v87_v9, 1  ;;  %v144_v11 = vpop.eup %143 }
  0x33   :  { %v65_v13 = vadd.f32 1.0, %v144_v11 }
  0x34   :  { %v89_v14 = vadd.f32 %v88_v10, %v87_v9 }
  0x35   :  { %145 = vrcp.f32 %v65_v13 }
  0x36   :  { %v90_v15 = vadd.f32 %v89_v14, %v82_v12 }
  0x38   :  { %91 = vst [vmem:[#allocation2 + $0x8] sm:$0x1] %v90_v15 }
  0x3f   :  { %v108_v16 = vld [vmem:[#allocation2 + $0x8] sm:$0xff]  ;;  %v146_v17 = vpop.eup %145 }
  0x40   :  { %111 = vst [vmem:[#allocation8 + $0x8] sm:$0xff] %v108_v16  ;;  %v92_v18 = vmul.f32 %v146_v17, %v136_v4  ;;  %v72_v19 = vsel %vm71_vm0, %v146_v17, 0.0 }
  0x41   :  { %v73_v20 = vrot.slane %v72_v19, 4 }
  0x42   :  { %v95_v21 = vsel %vm71_vm0, %v92_v18, 0.0 }
  0x43   :  { %v96_v22 = vrot.slane %v95_v21, 4  ;;  %v74_v23 = vadd.f32 %v73_v20, %v72_v19 }
  0x45   :  { %v75_v24 = vrot.slane %v74_v23, 2  ;;  %v97_v25 = vadd.f32 %v96_v22, %v95_v21 }
  0x47   :  { %v76_v26 = vadd.f32 %v75_v24, %v74_v23  ;;  %v98_v27 = vrot.slane %v97_v25, 2 }
  0x49   :  { %v77_v28 = vrot.slane %v76_v26, 1  ;;  %v99_v29 = vadd.f32 %v98_v27, %v97_v25 }
  0x4b   :  { %v78_v31 = vadd.f32 %v77_v28, %v76_v26  ;;  %v100_v32 = vrot.slane %v99_v29, 1 }
  0x4d   :  { %v79_v34 = vadd.f32 %v78_v31, %v70_v30  ;;  %v101_v35 = vadd.f32 %v100_v32, %v99_v29 }
  0x4f   :  { %80 = vst [vmem:[#allocation2] sm:$0x1] %v79_v34  ;;  %v102_v36 = vadd.f32 %v101_v35, %v94_v33 }
  0x51   :  { %103 = vst [vmem:[#allocation2 + $0x10] sm:$0x1] %v102_v36 }
  0x56   :  { %v107_v37 = vld [vmem:[#allocation2] sm:$0xff] }
  0x57   :  { %110 = vst [vmem:[#allocation8] sm:$0xff] %v107_v37 }
  0x58   :  { %v109_v38 = vld [vmem:[#allocation2 + $0x10] sm:$0xff] }
  0x59   :  { %112 = vst [vmem:[#allocation8 + $0x10] sm:$0xff] %v109_v38 }
  0x5a   :  { %202 = shalt.err (!%p199_p6)
}
  0x5b   :  { %s203_s8 = scalar_lea.hbm %s281_s2, 384 }
  0x5c   :  { %p204_p7 = scmp.ne.s32.totalorder %s281_s2, %s203_s8  ;;  %p207_p8 = scmp.lt.u32.totalorder %s203_s8, %s281_s2 }
  0x5e   :  { %p209_p9 = pnand %p207_p8, %p204_p7 }
  0x60   :  { %212 = shalt.err (!%p209_p9)
}
  0x61   :  { %s223_s13 = smov 128   ;;  %s224_s14 = smov 8  }
  0x62   :  { %124 = dma.vmem_to_hbm [thread:$0]  %s119_s4, 384, %s281_s2, [#allocation5], %s223_s13, %s223_s13, %s224_s14  }
  0x63   :  { %217 = dma.done.wait [#allocation5], 384  }
  0x64   :  { %218 = vsyncadd [#allocation5], 4294966912 }
  0x65   :  { %128 = vsyncpa [#allocation4], 1 }
  0x66   :  { %129 = vsyncpa [#allocation7], 1 }
  0x67   :  { %130 = vsyncpa [#allocation5], 1 }

</bundles_post_ra>
